<compile_context>
chip_gen: v7x
topology: tpu7x:2x2x1
jax: 0.10.0
libtpu: 0.0.40
codegen_flags: <defaults>
</compile_context>

<pallas_src>
import jax
import jax.numpy as jnp
from jax.experimental import pallas as pl
from jax.experimental.pallas import tpu as pltpu


def _round_up(x: int, m: int) -> int:
    return (x + m - 1) // m * m


def _cdiv(a: int, b: int) -> int:
    return (a + b - 1) // b


def _vmem_capacity_bytes() -> int:
    """Per-TensorCore VMEM capacity; conservative (v7x) fallback."""
    try:
        info = pltpu.get_tpu_info()
        cap = getattr(info, "vmem_capacity_bytes", None)
        if cap:
            return int(cap)
    except Exception:
        pass
    return 64 << 20


def _tile_budget(tm, th, d_in_p, d_out_p, nh, cb, xbytes, obytes):
    """VMEM bytes needed for one pipelined step (incl. f32 intermediates)."""
    wbuf = 1 if nh == 1 else 2                       # weight chunks: single- or double-buffered
    return (2 * tm * d_in_p * xbytes                 # x tiles (double-buffered)
            + 2 * tm * d_out_p * obytes              # out tiles (double-buffered)
            + wbuf * (d_in_p * th + th * d_out_p) * cb   # weight chunk(s), bf16
            + wbuf * th * 4 + d_out_p * 4            # bias chunk(s), f32
            + tm * d_out_p * 4                       # f32 accumulator scratch
            + tm * th * (4 + cb)                     # h (f32) + compute-dtype copy
            + tm * d_in_p * cb)                      # in-kernel cast of x


def _choose_tiling(H, d_in_p, d_out_p, tm_max, cap, cb, xbytes=4, obytes=4):
    """Pick (tm_max, th, nh, H_pad) so one step fits the VMEM cap."""
    h_p = _round_up(H, 128)
    tm = tm_max
    while True:
        th = h_p
        while th > 128 and _tile_budget(tm, th, d_in_p, d_out_p,
                                        _cdiv(h_p, th), cb, xbytes, obytes) > cap:
            th -= 128
        if (_tile_budget(tm, th, d_in_p, d_out_p, _cdiv(h_p, th),
                         cb, xbytes, obytes) <= cap) or tm <= 8:
            break
        tm = max(8, _round_up(tm // 2, 8))
    nh = _cdiv(h_p, th)
    h_pad = nh * th                                  # padded so th divides it exactly
    return tm, th, nh, h_pad


def ed_kernel(x_ref, we_ref, be_ref, wd_ref, bd_ref, out_ref, acc_ref):
    """grid = (batch tiles [parallel], hidden chunks [arbitrary])."""
    h_idx = pl.program_id(1)

    @pl.when(h_idx == 0)
    def _init():
        acc_ref[...] = jnp.zeros_like(acc_ref)

    # x stays in its input dtype in HBM; cast to the MXU dtype on the VPU
    # (hidden under the DMA) instead of paying a separate XLA pass.
    x = x_ref[...].astype(we_ref.dtype)
    # encoder chunk: h = relu(x @ We[:, hc] + be[hc])   (f32 accumulation)
    h = jnp.dot(x, we_ref[...], preferred_element_type=jnp.float32)
    h = jnp.maximum(h + be_ref[...], 0.0)
    # decoder chunk accumulation: acc += h @ Wd[hc, :]
    acc_ref[...] += jnp.dot(h.astype(wd_ref.dtype), wd_ref[...],
                            preferred_element_type=jnp.float32)

    @pl.when(h_idx == pl.num_programs(1) - 1)
    def _finalize():
        out_ref[...] = (acc_ref[...] + bd_ref[...]).astype(out_ref.dtype)


def prepare_ed_params(w_enc, b_enc, w_dec, b_dec, *,
                      compute_dtype=jnp.bfloat16, tm_max=None):
    """One-time padding / bf16 cast of the weights + tiling decisions.

    w_enc: (D_in, H), b_enc: (H,), w_dec: (H, D_out), b_dec: (D_out,).
    """
    D_in, H = w_enc.shape
    H2, D_out = w_dec.shape
    assert H == H2, "encoder/decoder hidden sizes must match"

    vmem_cap = _vmem_capacity_bytes()
    if tm_max is None:
        # v7x (64 MiB VMEM): tm<=512; v5e/v6e (128 MiB): tm<=1024.
        tm_max = 512 if vmem_cap <= (80 << 20) else 1024
    cap = int(0.75 * vmem_cap)                       # headroom for Mosaic scratch

    d_in_p = _round_up(D_in, 128)
    d_out_p = _round_up(D_out, 128)
    cb = jnp.dtype(compute_dtype).itemsize
    tm_max, th, nh, h_pad = _choose_tiling(H, d_in_p, d_out_p, tm_max, cap, cb)

    cd = compute_dtype
    we_p = jnp.zeros((d_in_p, h_pad), cd).at[:D_in, :H].set(w_enc.astype(cd))
    wd_p = jnp.zeros((h_pad, d_out_p), cd).at[:H, :D_out].set(w_dec.astype(cd))
    be_p = jnp.zeros((1, h_pad), jnp.float32).at[:, :H].set(
        jnp.reshape(b_enc, (1, -1)).astype(jnp.float32))
    bd_p = jnp.zeros((1, d_out_p), jnp.float32).at[:, :D_out].set(
        jnp.reshape(b_dec, (1, -1)).astype(jnp.float32))

    return dict(we=we_p, be=be_p, wd=wd_p, bd=bd_p,
                D_in=D_in, D_out=D_out, D_in_p=d_in_p, D_out_p=d_out_p,
                H_pad=h_pad, th=th, nh=nh, tm_max=tm_max,
                vmem_cap=vmem_cap, compute_dtype=compute_dtype)


def ed_forward(x, params, *, out_dtype=None):
    """Fused encoder->decoder forward. x: (B, D_in)."""
    B, D_in = x.shape
    assert D_in == params["D_in"]
    out_dtype = jnp.dtype(out_dtype) if out_dtype is not None else x.dtype

    d_in_p, d_out_p = params["D_in_p"], params["D_out_p"]
    D_out, h_pad = params["D_out"], params["H_pad"]
    th, nh, tm_max = params["th"], params["nh"], params["tm_max"]
    cd = params["compute_dtype"]

    # Balanced batch tiles; force >=2 tiles when possible so the parallel
    # axis can shard across both v7x TensorCores (harmless on 1-TC chips).
    b8 = _round_up(B, 8)
    nb = _cdiv(b8, tm_max)
    if nb < 2 and b8 >= 16:
        nb = 2
    tm = _round_up(_cdiv(b8, nb), 8)
    nb = _cdiv(b8, tm)
    b_p = nb * tm

    # Pad x only if needed (kept in its original dtype; cast happens in-kernel).
    if (b_p, d_in_p) != (B, D_in):
        x_p = jnp.zeros((b_p, d_in_p), x.dtype).at[:B, :D_in].set(x)
    else:
        x_p = x

    cb = jnp.dtype(cd).itemsize
    xb = jnp.dtype(x.dtype).itemsize
    ob = jnp.dtype(out_dtype).itemsize
    budget = _tile_budget(tm, th, d_in_p, d_out_p, nh, cb, xb, ob)
    cap = int(0.75 * params["vmem_cap"])
    vmem_limit = min(cap, max(16 << 20, int(1.3 * budget) + (2 << 20)))

    cost = pl.CostEstimate(
        flops=2 * b_p * h_pad * (d_in_p + d_out_p),
        transcendentals=0,
        bytes_accessed=(x_p.size * xb
                        + params["we"].size * cb + params["wd"].size * cb
                        + params["be"].size * 4 + params["bd"].size * 4
                        + b_p * d_out_p * ob))

    def _run(single_buffer):
        # Single-buffer the grid-invariant operands (their block index never
        # changes) to halve their VMEM footprint.
        weights_invariant = single_buffer and (nh == 1)

        def wspec(shape, imap, invariant):
            if invariant:
                return pl.BlockSpec(shape, imap, pipeline_mode=pl.Buffered(1))
            return pl.BlockSpec(shape, imap)

        in_specs = [
            pl.BlockSpec((tm, d_in_p), lambda i, h: (i, 0)),              # x
            wspec((d_in_p, th), lambda i, h: (0, h), weights_invariant),  # We chunk
            wspec((1, th), lambda i, h: (0, h), weights_invariant),       # be chunk
            wspec((th, d_out_p), lambda i, h: (h, 0), weights_invariant), # Wd chunk
            wspec((1, d_out_p), lambda i, h: (0, 0), single_buffer),      # bd
        ]
        call = pl.pallas_call(
            ed_kernel,
            out_shape=jax.ShapeDtypeStruct((b_p, d_out_p), out_dtype),
            grid_spec=pltpu.PrefetchScalarGridSpec(
                num_scalar_prefetch=0,
                grid=(nb, nh),
                in_specs=in_specs,
                out_specs=pl.BlockSpec((tm, d_out_p), lambda i, h: (i, 0)),
                scratch_shapes=[pltpu.VMEM((tm, d_out_p), jnp.float32)],
            ),
            compiler_params=pltpu.CompilerParams(
                dimension_semantics=("parallel", "arbitrary"),
                vmem_limit_bytes=vmem_limit),
            cost_estimate=cost,
        )
        return call(x_p, params["we"], params["be"], params["wd"], params["bd"])

    try:
        out_p = _run(True)
    except Exception:
        # pl.Buffered(1) unsupported on this Pallas build -> default buffering.
        out_p = _run(False)

    return out_p[:B, :D_out]


def ed_reference(x, w_enc, b_enc, w_dec, b_dec):
    state = jnp.maximum(x @ w_enc + jnp.reshape(b_enc, (1, -1)), 0.0)
    return state @ w_dec + jnp.reshape(b_dec, (1, -1))


if __name__ == "__main__":
    # Small shapes consistent with a Linear encoder/decoder pair.
    # B=10 deliberately exercises the batch-padding / remainder-tile path.
    B, D_in, H, D_out = 10, 32, 64, 32

    key = jax.random.PRNGKey(0)
    k_x, k_we, k_be, k_wd, k_bd = jax.random.split(key, 5)

    x = jax.random.normal(k_x, (B, D_in), dtype=jnp.float32)
    w_enc = jax.random.normal(k_we, (D_in, H), dtype=jnp.float32) * 0.1
    b_enc = jax.random.normal(k_be, (H,), dtype=jnp.float32) * 0.1
    w_dec = jax.random.normal(k_wd, (H, D_out), dtype=jnp.float32) * 0.1
    b_dec = jax.random.normal(k_bd, (D_out,), dtype=jnp.float32) * 0.1

    # One-time weight reformat (padded + bf16), reused across forward calls.
    params = prepare_ed_params(w_enc, b_enc, w_dec, b_dec)

    out = jax.block_until_ready(ed_forward(x, params))

    ref = ed_reference(x, w_enc, b_enc, w_dec, b_dec)
    assert out.shape == (B, D_out)
    # bf16 MXU inputs with f32 accumulation -> loose tolerance vs f32 reference
    assert jnp.allclose(out, ref, atol=5e-2, rtol=5e-2), \
        float(jnp.max(jnp.abs(out - ref)))

    print("KERNEL_OK")
</pallas_src>

<mosaic_0001>
module attributes {stable_mosaic.version = 11 : i64} {
  func.func @ed_kernel(%arg0: i32, %arg1: i32, %arg2: memref<8x128xf32, #tpu.memory_space<vmem>>, %arg3: memref<128x128xbf16, #tpu.memory_space<vmem>>, %arg4: memref<1x128xf32, #tpu.memory_space<vmem>>, %arg5: memref<128x128xbf16, #tpu.memory_space<vmem>>, %arg6: memref<1x128xf32, #tpu.memory_space<vmem>>, %arg7: memref<8x128xf32, #tpu.memory_space<vmem>>, %arg8: memref<8x128xf32, #tpu.memory_space<vmem>>) attributes {dimension_semantics = [#tpu.dimension_semantics<parallel>, #tpu.dimension_semantics<arbitrary>], iteration_bounds = array<i64: 2, 1>, scalar_prefetch = 0 : i64, scratch_operands = 1 : i64, tpu.core_type = #tpu.core_type<tc>, window_params = [{transform_indices = @transform_0, window_bounds = array<i64: 8, 128>}, {pipeline_mode = #tpu.pipeline_mode<synchronous>, transform_indices = @transform_1, window_bounds = array<i64: 128, 128>}, {pipeline_mode = #tpu.pipeline_mode<synchronous>, transform_indices = @transform_2, window_bounds = array<i64: 1, 128>}, {pipeline_mode = #tpu.pipeline_mode<synchronous>, transform_indices = @transform_3, window_bounds = array<i64: 128, 128>}, {pipeline_mode = #tpu.pipeline_mode<synchronous>, transform_indices = @transform_4, window_bounds = array<i64: 1, 128>}, {transform_indices = @transform_5, window_bounds = array<i64: 8, 128>}]} {
    %c0_i32 = arith.constant 0 : i32
    %0 = arith.cmpi eq, %arg1, %c0_i32 : i32
    %1 = arith.extui %0 : i1 to i32
    %c0_i32_0 = arith.constant 0 : i32
    %2 = arith.cmpi ne, %1, %c0_i32_0 : i32
    scf.if %2 {
      %cst_16 = arith.constant 0.000000e+00 : f32
      %21 = vector.broadcast %cst_16 : f32 to vector<8x128xf32>
      %c0_17 = arith.constant 0 : index
      %c0_18 = arith.constant 0 : index
      %22 = vector.load %arg8[%c0_17, %c0_18] : memref<8x128xf32, #tpu.memory_space<vmem>>, vector<8x128xf32>
      tpu.vector_store %arg8[%c0_17, %c0_18], %21 {strides = array<i32>} : memref<8x128xf32, #tpu.memory_space<vmem>>, vector<8x128xf32>,
    } else {
    }
    %c0 = arith.constant 0 : index
    %c0_1 = arith.constant 0 : index
    %3 = vector.load %arg2[%c0, %c0_1] : memref<8x128xf32, #tpu.memory_space<vmem>>, vector<8x128xf32>
    %4 = arith.truncf %3 : vector<8x128xf32> to vector<8x128xbf16>
    %c0_2 = arith.constant 0 : index
    %c0_3 = arith.constant 0 : index
    %5 = vector.load %arg3[%c0_2, %c0_3] : memref<128x128xbf16, #tpu.memory_space<vmem>>, vector<128x128xbf16>
    %cst = arith.constant dense<0.000000e+00> : vector<8x128xf32>
    %6 = tpu.matmul %4, %5, %cst {dimension_numbers = #tpu.dot_dimension_numbers<[1], [0], [0], [1], [0, 0, 1, 1], [], []>} : vector<8x128xbf16>, vector<128x128xbf16>, vector<8x128xf32> -> vector<8x128xf32>
    %c0_4 = arith.constant 0 : index
    %c0_5 = arith.constant 0 : index
    %7 = vector.load %arg4[%c0_4, %c0_5] : memref<1x128xf32, #tpu.memory_space<vmem>>, vector<1x128xf32>
    %8 = vector.broadcast %7 : vector<1x128xf32> to vector<8x128xf32>
    %9 = arith.addf %6, %8 : vector<8x128xf32>
    %cst_6 = arith.constant 0.000000e+00 : f32
    %10 = vector.broadcast %cst_6 : f32 to vector<8x128xf32>
    %11 = arith.maximumf %9, %10 : vector<8x128xf32>
    %c0_7 = arith.constant 0 : index
    %c0_8 = arith.constant 0 : index
    %12 = vector.load %arg8[%c0_7, %c0_8] : memref<8x128xf32, #tpu.memory_space<vmem>>, vector<8x128xf32>
    %13 = arith.truncf %11 : vector<8x128xf32> to vector<8x128xbf16>
    %c0_9 = arith.constant 0 : index
    %c0_10 = arith.constant 0 : index
    %14 = vector.load %arg5[%c0_9, %c0_10] : memref<128x128xbf16, #tpu.memory_space<vmem>>, vector<128x128xbf16>
    %cst_11 = arith.constant dense<0.000000e+00> : vector<8x128xf32>
    %15 = tpu.matmul %13, %14, %cst_11 {dimension_numbers = #tpu.dot_dimension_numbers<[1], [0], [0], [1], [0, 0, 1, 1], [], []>} : vector<8x128xbf16>, vector<128x128xbf16>, vector<8x128xf32> -> vector<8x128xf32>
    %16 = arith.addf %12, %15 : vector<8x128xf32>
    %c0_12 = arith.constant 0 : index
    %c0_13 = arith.constant 0 : index
    %17 = vector.load %arg8[%c0_12, %c0_13] : memref<8x128xf32, #tpu.memory_space<vmem>>, vector<8x128xf32>
    tpu.vector_store %arg8[%c0_12, %c0_13], %16 {strides = array<i32>} : memref<8x128xf32, #tpu.memory_space<vmem>>, vector<8x128xf32>,
    %c0_i32_14 = arith.constant 0 : i32
    %18 = arith.cmpi eq, %arg1, %c0_i32_14 : i32
    %19 = arith.extui %18 : i1 to i32
    %c0_i32_15 = arith.constant 0 : i32
    %20 = arith.cmpi ne, %19, %c0_i32_15 : i32
    scf.if %20 {
      %c0_16 = arith.constant 0 : index
      %c0_17 = arith.constant 0 : index
      %21 = vector.load %arg8[%c0_16, %c0_17] : memref<8x128xf32, #tpu.memory_space<vmem>>, vector<8x128xf32>
      %c0_18 = arith.constant 0 : index
      %c0_19 = arith.constant 0 : index
      %22 = vector.load %arg6[%c0_18, %c0_19] : memref<1x128xf32, #tpu.memory_space<vmem>>, vector<1x128xf32>
      %23 = vector.broadcast %22 : vector<1x128xf32> to vector<8x128xf32>
      %24 = arith.addf %21, %23 : vector<8x128xf32>
      %c0_20 = arith.constant 0 : index
      %c0_21 = arith.constant 0 : index
      %25 = vector.load %arg7[%c0_20, %c0_21] : memref<8x128xf32, #tpu.memory_space<vmem>>, vector<8x128xf32>
      tpu.vector_store %arg7[%c0_20, %c0_21], %24 {strides = array<i32>} : memref<8x128xf32, #tpu.memory_space<vmem>>, vector<8x128xf32>,
    } else {
    }
    return
  }
  func.func @transform_0(%arg0: i32, %arg1: i32) -> (i32, i32) {
    %c0_i32 = arith.constant 0 : i32
    %c0_i32_0 = arith.constant 0 : i32
    return %arg0, %c0_i32 : i32, i32
  }
  func.func @transform_1(%arg0: i32, %arg1: i32) -> (i32, i32) {
    %c0_i32 = arith.constant 0 : i32
    %c0_i32_0 = arith.constant 0 : i32
    return %c0_i32, %arg1 : i32, i32
  }
  func.func @transform_2(%arg0: i32, %arg1: i32) -> (i32, i32) {
    %c0_i32 = arith.constant 0 : i32
    %c0_i32_0 = arith.constant 0 : i32
    return %c0_i32, %arg1 : i32, i32
  }
  func.func @transform_3(%arg0: i32, %arg1: i32) -> (i32, i32) {
    %c0_i32 = arith.constant 0 : i32
    %c0_i32_0 = arith.constant 0 : i32
    return %arg1, %c0_i32 : i32, i32
  }
  func.func @transform_4(%arg0: i32, %arg1: i32) -> (i32, i32) {
    %c0_i32 = arith.constant 0 : i32
    %c0_i32_0 = arith.constant 0 : i32
    %c0_i32_1 = arith.constant 0 : i32
    return %c0_i32, %c0_i32_0 : i32, i32
  }
  func.func @transform_5(%arg0: i32, %arg1: i32) -> (i32, i32) {
    %c0_i32 = arith.constant 0 : i32
    %c0_i32_0 = arith.constant 0 : i32
    return %arg0, %c0_i32 : i32, i32
  }
}

module attributes {stable_mosaic.version = 11 : i64} {
  func.func @ed_kernel(%arg0: i32, %arg1: i32, %arg2: memref<8x128xf32, #tpu.memory_space<vmem>>, %arg3: memref<128x128xbf16, #tpu.memory_space<vmem>>, %arg4: memref<1x128xf32, #tpu.memory_space<vmem>>, %arg5: memref<128x128xbf16, #tpu.memory_space<vmem>>, %arg6: memref<1x128xf32, #tpu.memory_space<vmem>>, %arg7: memref<8x128xf32, #tpu.memory_space<vmem>>, %arg8: memref<8x128xf32, #tpu.memory_space<vmem>>) attributes {dimension_semantics = [#tpu.dimension_semantics<parallel>, #tpu.dimension_semantics<arbitrary>], iteration_bounds = array<i64: 2, 1>, scalar_prefetch = 0 : i64, scratch_operands = 1 : i64, tpu.core_type = #tpu.core_type<tc>, window_params = [{transform_indices = @transform_0, window_bounds = array<i64: 8, 128>}, {transform_indices = @transform_1, window_bounds = array<i64: 128, 128>}, {transform_indices = @transform_2, window_bounds = array<i64: 1, 128>}, {transform_indices = @transform_3, window_bounds = array<i64: 128, 128>}, {pipeline_mode = #tpu.pipeline_mode<synchronous>, transform_indices = @transform_4, window_bounds = array<i64: 1, 128>}, {transform_indices = @transform_5, window_bounds = array<i64: 8, 128>}]} {
    %c0_i32 = arith.constant 0 : i32
    %0 = arith.cmpi eq, %arg1, %c0_i32 : i32
    %1 = arith.extui %0 : i1 to i32
    %c0_i32_0 = arith.constant 0 : i32
    %2 = arith.cmpi ne, %1, %c0_i32_0 : i32
    scf.if %2 {
      %cst_16 = arith.constant 0.000000e+00 : f32
      %21 = vector.broadcast %cst_16 : f32 to vector<8x128xf32>
      %c0_17 = arith.constant 0 : index
      %c0_18 = arith.constant 0 : index
      %22 = vector.load %arg8[%c0_17, %c0_18] : memref<8x128xf32, #tpu.memory_space<vmem>>, vector<8x128xf32>
      tpu.vector_store %arg8[%c0_17, %c0_18], %21 {strides = array<i32>} : memref<8x128xf32, #tpu.memory_space<vmem>>, vector<8x128xf32>,
    } else {
    }
    %c0 = arith.constant 0 : index
    %c0_1 = arith.constant 0 : index
    %3 = vector.load %arg2[%c0, %c0_1] : memref<8x128xf32, #tpu.memory_space<vmem>>, vector<8x128xf32>
    %4 = arith.truncf %3 : vector<8x128xf32> to vector<8x128xbf16>
    %c0_2 = arith.constant 0 : index
    %c0_3 = arith.constant 0 : index
    %5 = vector.load %arg3[%c0_2, %c0_3] : memref<128x128xbf16, #tpu.memory_space<vmem>>, vector<128x128xbf16>
    %cst = arith.constant dense<0.000000e+00> : vector<8x128xf32>
    %6 = tpu.matmul %4, %5, %cst {dimension_numbers = #tpu.dot_dimension_numbers<[1], [0], [0], [1], [0, 0, 1, 1], [], []>} : vector<8x128xbf16>, vector<128x128xbf16>, vector<8x128xf32> -> vector<8x128xf32>
    %c0_4 = arith.constant 0 : index
    %c0_5 = arith.constant 0 : index
    %7 = vector.load %arg4[%c0_4, %c0_5] : memref<1x128xf32, #tpu.memory_space<vmem>>, vector<1x128xf32>
    %8 = vector.broadcast %7 : vector<1x128xf32> to vector<8x128xf32>
    %9 = arith.addf %6, %8 : vector<8x128xf32>
    %cst_6 = arith.constant 0.000000e+00 : f32
    %10 = vector.broadcast %cst_6 : f32 to vector<8x128xf32>
    %11 = arith.maximumf %9, %10 : vector<8x128xf32>
    %c0_7 = arith.constant 0 : index
    %c0_8 = arith.constant 0 : index
    %12 = vector.load %arg8[%c0_7, %c0_8] : memref<8x128xf32, #tpu.memory_space<vmem>>, vector<8x128xf32>
    %13 = arith.truncf %11 : vector<8x128xf32> to vector<8x128xbf16>
    %c0_9 = arith.constant 0 : index
    %c0_10 = arith.constant 0 : index
    %14 = vector.load %arg5[%c0_9, %c0_10] : memref<128x128xbf16, #tpu.memory_space<vmem>>, vector<128x128xbf16>
    %cst_11 = arith.constant dense<0.000000e+00> : vector<8x128xf32>
    %15 = tpu.matmul %13, %14, %cst_11 {dimension_numbers = #tpu.dot_dimension_numbers<[1], [0], [0], [1], [0, 0, 1, 1], [], []>} : vector<8x128xbf16>, vector<128x128xbf16>, vector<8x128xf32> -> vector<8x128xf32>
    %16 = arith.addf %12, %15 : vector<8x128xf32>
    %c0_12 = arith.constant 0 : index
    %c0_13 = arith.constant 0 : index
    %17 = vector.load %arg8[%c0_12, %c0_13] : memref<8x128xf32, #tpu.memory_space<vmem>>, vector<8x128xf32>
    tpu.vector_store %arg8[%c0_12, %c0_13], %16 {strides = array<i32>} : memref<8x128xf32, #tpu.memory_space<vmem>>, vector<8x128xf32>,
    %c0_i32_14 = arith.constant 0 : i32
    %18 = arith.cmpi eq, %arg1, %c0_i32_14 : i32
    %19 = arith.extui %18 : i1 to i32
    %c0_i32_15 = arith.constant 0 : i32
    %20 = arith.cmpi ne, %19, %c0_i32_15 : i32
    scf.if %20 {
      %c0_16 = arith.constant 0 : index
      %c0_17 = arith.constant 0 : index
      %21 = vector.load %arg8[%c0_16, %c0_17] : memref<8x128xf32, #tpu.memory_space<vmem>>, vector<8x128xf32>
      %c0_18 = arith.constant 0 : index
      %c0_19 = arith.constant 0 : index
      %22 = vector.load %arg6[%c0_18, %c0_19] : memref<1x128xf32, #tpu.memory_space<vmem>>, vector<1x128xf32>
      %23 = vector.broadcast %22 : vector<1x128xf32> to vector<8x128xf32>
      %24 = arith.addf %21, %23 : vector<8x128xf32>
      %c0_20 = arith.constant 0 : index
      %c0_21 = arith.constant 0 : index
      %25 = vector.load %arg7[%c0_20, %c0_21] : memref<8x128xf32, #tpu.memory_space<vmem>>, vector<8x128xf32>
      tpu.vector_store %arg7[%c0_20, %c0_21], %24 {strides = array<i32>} : memref<8x128xf32, #tpu.memory_space<vmem>>, vector<8x128xf32>,
    } else {
    }
    return
  }
  func.func @transform_0(%arg0: i32, %arg1: i32) -> (i32, i32) {
    %c0_i32 = arith.constant 0 : i32
    %c0_i32_0 = arith.constant 0 : i32
    return %arg0, %c0_i32 : i32, i32
  }
  func.func @transform_1(%arg0: i32, %arg1: i32) -> (i32, i32) {
    %c0_i32 = arith.constant 0 : i32
    %c0_i32_0 = arith.constant 0 : i32
    return %c0_i32, %arg1 : i32, i32
  }
  func.func @transform_2(%arg0: i32, %arg1: i32) -> (i32, i32) {
    %c0_i32 = arith.constant 0 : i32
    %c0_i32_0 = arith.constant 0 : i32
    return %c0_i32, %arg1 : i32, i32
  }
  func.func @transform_3(%arg0: i32, %arg1: i32) -> (i32, i32) {
    %c0_i32 = arith.constant 0 : i32
    %c0_i32_0 = arith.constant 0 : i32
    return %arg1, %c0_i32 : i32, i32
  }
  func.func @transform_4(%arg0: i32, %arg1: i32) -> (i32, i32) {
    %c0_i32 = arith.constant 0 : i32
    %c0_i32_0 = arith.constant 0 : i32
    %c0_i32_1 = arith.constant 0 : i32
    return %c0_i32, %c0_i32_0 : i32, i32
  }
  func.func @transform_5(%arg0: i32, %arg1: i32) -> (i32, i32) {
    %c0_i32 = arith.constant 0 : i32
    %c0_i32_0 = arith.constant 0 : i32
    return %arg0, %c0_i32 : i32, i32
  }
}

</mosaic_0001>

<bundles_post_ra>
// kernel: tpu_custom_call.1
= control target key start
LH: loop header
LB: loop body
LE: loop exit
PB: predicated region body
PF: predicated region fallthrough
CT: control target
= control target key end

     0   :  { %10 = vsyncpa [#allocation4], 0  ;;  %s1351_s0 = inlined_call_operand.hbm [shape: f32[16,128], index: 0, kind: input, shape index: {}]   ;;  %s1352_s1 = inlined_call_operand.hbm [shape: bf16[128,128], index: 1, kind: input, shape index: {}]   ;;  %s1353_s2 = inlined_call_operand.vmem [shape: f32[1,128], index: 2, kind: input, shape index: {}]   ;;  %s1354_s3 = inlined_call_operand.hbm [shape: bf16[128,128], index: 3, kind: input, shape index: {}]   ;;  %s1355_s4 = inlined_call_operand.vmem [shape: f32[1,128], index: 4, kind: input, shape index: {}]   ;;  %s1356_s5 = inlined_call_operand.hbm [shape: f32[16,128], index: 5, kind: output, shape index: {}]  }
   0x1   :  { %12 = vsyncpa [#allocation4 + $0x1], 0 }
   0x2   :  { %13 = vsyncpa [#allocation7], 0 }
   0x3   :  { %14 = vsyncpa [#allocation5], 0 }
   0x4   :  { %16 = vsyncpa [#allocation5 + $0x1], 0  ;;  %s1088_s18 = smov 0   ;;  %s1090_s19 = smov 0  }
   0x5   :  { %s1092_s20 = smov 0   ;;  %s1094_s21 = smov 0  }
   0x6   :  { %s1096_s22 = smov 0   ;;  %s1098_s23 = smov 0  }
   0x7 LB: > { %s679_s24 = sadd.s32 4294967295, %s1048_s23   ;;  %s680_s25 = sadd.s32 4294967294, %s1048_s23   ;;  %s1048_s23 = sphi %s1098_s23, %s22_s23   ;;  %s1044_s22 = sphi %s1096_s22, %s1378_s22   ;;  %s1040_s21 = sphi %s1094_s21, %s1377_s21   ;;  %s1036_s20 = sphi %s1092_s20, %s1376_s20   ;;  %s1032_s19 = sphi %s1090_s19, %s1375_s19   ;;  %s1028_s18 = sphi %s1088_s18, %s1374_s18  }
   0x8   : > { %p54_p0 = scmp.ne.s32.totalorder %s1032_s19, %s1028_s18  ;;  %p1122_p1 = scmp.eq.s32.totalorder %s679_s24, 0 }
   0x9   : > { %p1126_p2 = scmp.eq.s32.totalorder %s679_s24, 1  ;;  %p183_p3 = scmp.eq.s32.totalorder %s680_s25, 1 }
   0xa   : > { %s1361_s26 = scalar_select %p1122_p1, 1, 0 }
   0xb   : > { %p1132_p4 = por %p1122_p1, %p54_p0  ;;  %p681_p5 = scmp.ge.s32.totalorder %s1048_s23, 1 }
   0xc   : > { %p1137_p6 = por %p183_p3, %p54_p0  ;;  %p190_p7 = scmp.lt.s32.totalorder %s1048_s23, 3 }
   0xd   : > { %s1363_s28 = scalar_select %p1132_p4, 1, 0 }
   0xe   : > { %s1364_s29 = scalar_select %p1137_p6, 1, 0 }
   0xf   : > { %p1142_p8 = pnand %p681_p5, %p190_p7  ;;  %s1050_s6 = smov [#allocation6]  }
  0x10   : > { %s204_s7 = sshll.u32 %s1050_s6, 4  ;;  %s1051_s9 = smov [#allocation8]   ;;  %s1146_s7 = int_to_ptr.vmem [resolvable:$true] %s204_s7 }
  0x11   : > { %p785_p9 = pneg %p1142_p8  ;;  %s226_s10 = sshll.u32 %s1051_s9, 4  ;;  %s1157_s10 = int_to_ptr.vmem [resolvable:$true] %s226_s10 }
  0x12   : > { %s876_s13 = scalar_lea.hbm %s1352_s1, 1024 }
  0x13   : > { %p1153_p11 = pnand %p785_p9, %p1122_p1  ;;  %p877_p12 = scmp.ne.s32.totalorder %s1352_s1, %s876_s13 }
  0x14   : > { %p883_p5 = scmp.lt.u32.totalorder %s876_s13, %s1352_s1 }
  0x15   : > { %p878_p13 = pneg %p1153_p11 }
  0x17   : > { %p879_p0 = pnand %p878_p13, %p877_p12 }
  0x19   : > { %p880_p3 = pneg %p879_p0 }
  0x1b   : > { %p885_p7 = pnand %p883_p5, %p880_p3 }
  0x1d   : > { %888 = shalt.err (!%p885_p7)
}
  0x1e   : > { %s889_s24 = scalar_lea.vmem %s1146_s7, 1024  ;;  %p897_p1 = scmp.lt.s32.totalorder %s1146_s7, %s1146_s7 }
  0x1f   : > { %p890_p9 = scmp.ne.s32.totalorder %s1146_s7, %s889_s24  ;;  %p898_p12 = scmp.lt.s32.totalorder %s889_s24, %s889_s24 }
  0x21   : > { %p892_p10 = pnand %p890_p9, %p878_p13  ;;  %p899_p0 = por %p898_p12, %p897_p1 }
  0x23   : > { %p893_p6 = pneg %p892_p10 }
  0x25   : > { %p900_p4 = pnand %p899_p0, %p893_p6 }
  0x27   : > { %903 = shalt.err (!%p900_p4)
}
  0x28   : > { %s1052_s25 = smov 64   ;;  %s1053_s6 = smov 4  }
  0x29   : > { %788 = dma.hbm_to_vmem [thread:$0]  (!%p1153_p11), %s1352_s1, 1024, %s1146_s7, [#allocation7], %s1052_s25, %s1052_s25, %s1053_s6  }
  0x2a   : > { %s904_s14 = scalar_lea.hbm %s1354_s3, 1024 }
  0x2b   : > { %p905_p1 = scmp.ne.s32.totalorder %s1354_s3, %s904_s14  ;;  %p911_p10 = scmp.lt.u32.totalorder %s904_s14, %s1354_s3 }
  0x2d   : > { %p907_p4 = pnand %p905_p1, %p878_p13 }
  0x2f   : > { %p908_p6 = pneg %p907_p4 }
  0x31   : > { %p913_p3 = pnand %p911_p10, %p908_p6 }
  0x33   : > { %916 = shalt.err (!%p913_p3)
}
  0x34   : > { %s917_s7 = scalar_lea.vmem %s1157_s10, 1024  ;;  %p925_p12 = scmp.lt.s32.totalorder %s1157_s10, %s1157_s10 }
  0x35   : > { %p918_p5 = scmp.ne.s32.totalorder %s1157_s10, %s917_s7  ;;  %p926_p0 = scmp.lt.s32.totalorder %s917_s7, %s917_s7 }
  0x37   : > { %p920_p7 = pnand %p918_p5, %p878_p13  ;;  %p927_p1 = por %p926_p0, %p925_p12 }
  0x39   : > { %p921_p9 = pneg %p920_p7 }
  0x3b   : > { %p928_p4 = pnand %p927_p1, %p921_p9 }
  0x3d   : > { %931 = shalt.err (!%p928_p4)
}
  0x3e   : > { %791 = dma.hbm_to_vmem [thread:$0]  (!%p1153_p11), %s1354_s3, 1024, %s1157_s10, [#allocation7], %s1052_s25, %s1052_s25, %s1053_s6  }
  0x3f   : > { %s34_s12 = sadd.s32 1, %s1044_s22  ;;  %s41_s13 = sadd.s32 1, %s1036_s20 }
  0x40   : > { %p36_p13 = scmp.ge.s32.totalorder %s34_s12, 2  ;;  %p48_p6 = scmp.ne.s32.totalorder %s1036_s20, %s1032_s19 }
  0x41   : > { %p49_p10 = scmp.eq.s32.totalorder %s1048_s23, 0  ;;  %p802_p3 = scmp.lt.s32.totalorder %s1048_s23, 2 }
  0x42   : > { %s1380_s12 = smov (%p36_p13, %s34_s12), 0  ;;  %p1221_p7 = por %p1126_p2, %p48_p6 }
  0x43   : > { %p50_p5 = por %p49_p10, %p48_p6  ;;  %s38_s14 = ssub.s32 %s1044_s22, %s1380_s12 }
  0x44   : > { %s1367_s8 = scalar_select %p1221_p7, 1, 0 }
  0x45   : > { %s243_s15 = sand.u32 1, %s1036_s20   ;;  %p39_p9 = scmp.eq.s32.totalorder %s38_s14, 0 }
  0x46   : > { %s686_s10 = sshll.u32 %s243_s15, 3  ;;  %s687_s25 = sshll.u32 %s1044_s22, 7 }
  0x47   : > { %s1230_s6 = scalar_select %p39_p9, %s1036_s20, %s41_s13  }
  0x48   : > { %s1235_s24 = scalar_lea.hbm %s1351_s0, %s687_s25  ;;  %s247_s27 = scalar_lea.vmem [#allocation3], %s686_s10 }
  0x49   : > { %s254_s7 = sshll.u32 %s247_s27, 4  ;;  %p1239_p2 = pnand %p802_p3, %p50_p5  ;;  %s1243_s7 = int_to_ptr.vmem [resolvable:$true] %s254_s7 }
  0x4a   : > { %s244_s11 = scalar_lea.sflag [#allocation4], %s243_s15  ;;  %s932_s13 = scalar_lea.hbm %s1235_s24, 128 }
  0x4b   : > { %p933_p11 = scmp.ne.s32.totalorder %s1235_s24, %s932_s13  ;;  %p934_p12 = pneg %p1239_p2 }
  0x4c   : > { %s937_s25 = scalar_lea.hbm %s1351_s0, 256  ;;  %p938_p4 = scmp.lt.u32.totalorder %s1235_s24, %s1351_s0 }
  0x4d   : > { %p935_p0 = pnand %p934_p12, %p933_p11  ;;  %p939_p13 = scmp.lt.u32.totalorder %s937_s25, %s932_s13 }
  0x4e   : > { %p941_p10 = scmp.lt.u32.totalorder %s932_s13, %s1235_s24 }
  0x4f   : > { %p936_p1 = pneg %p935_p0  ;;  %p940_p6 = por %p939_p13, %p938_p4 }
  0x51   : > { %p942_p3 = por %p941_p10, %p940_p6 }
  0x53   : > { %p943_p5 = pnand %p942_p3, %p936_p1 }
  0x55   : > { %946 = shalt.err (!%p943_p5)
}
  0x56   : > { %s947_s15 = scalar_lea.vmem %s1243_s7, 128  ;;  %s1054_s27 = smov [#allocation3]  }
  0x57   : > { %p948_p9 = scmp.ne.s32.totalorder %s1243_s7, %s947_s15  ;;  %s952_s14 = sshll.u32 %s1054_s27, 4  ;;  %s953_s14 = int_to_ptr.vmem [resolvable:$false] %s952_s14 }
  0x58   : > { %s954_s10 = scalar_lea.vmem %s953_s14, 256  ;;  %p955_p7 = scmp.lt.s32.totalorder %s1243_s7, %s953_s14 }
  0x59   : > { %p950_p11 = pnand %p948_p9, %p934_p12  ;;  %p956_p4 = scmp.lt.s32.totalorder %s954_s10, %s947_s15 }
  0x5b   : > { %p951_p0 = pneg %p950_p11  ;;  %p957_p13 = por %p956_p4, %p955_p7 }
  0x5d   : > { %p958_p6 = pnand %p957_p13, %p951_p0 }
  0x5f   : > { %961 = shalt.err (!%p958_p6)
}
  0x60   : > { %795 = dma.hbm_to_vmem [thread:$0]  (!%p1239_p2), %s1235_s24, 128, %s1243_s7, %s244_s11  }
  0x61   : > { %263 = sbr.rel (%p1142_p8) target bundleno = 588 (0x24c), region = 40  ;;  %s1273_s13 = sand.u32 (!%p1142_p8), 1, %s1032_s19  }
  0x62   : > { %s689_s25 = sshll.u32 (!%p1142_p8), %s1273_s13, 3  ;;  %s266_s16 = scalar_lea.sflag (!%p1142_p8), [#allocation4], %s1273_s13 }
  0x63   : > { %s1279_s17 = scalar_lea.vmem (!%p1142_p8), [#allocation3], %s689_s25  ;;  %p1369_p7 = scmp.ne.s32.totalorder (!%p1142_p8), %s1363_s28, 0 }
  0x68   : > { %1015 = dma.done.wait (%p1369_p7), %s266_s16, 128  }
  0x69   : > { %1017 = vsyncadd (%p1369_p7), %s266_s16, 4294967168  ;;  %p1370_p2 = scmp.ne.s32.totalorder %s1361_s26, 0 }
  0x6b   : > { %1019 = dma.done.wait (%p1370_p2), [#allocation7], 2048  }
  0x6c   : > { %1021 = vsyncadd (%p1370_p2), [#allocation7], 4294965248  ;;  %v1055_v0 = vmov 0.0   ;;  %vm1056_vm0 = vmmov 0   ;;  %v860_v1 = vld [vmem:[#allocation6] sm:$0xff]   ;;  %v861_v2 = vld [vmem:[#allocation6 + $0x8] sm:$0xff]  }
  0x6d   : > { %733 = vmatprep.subr.bf16.mxu0 %v1055_v0  ;;  %749 = vmatprep.mubr.msk.bf16.mxu0 %vm1056_vm0, %v1055_v0  ;;  %v862_v3 = vld [vmem:[#allocation6 + $0x10] sm:$0xff]   ;;  %v868_v4 = vld [vmem:[#allocation8] sm:$0xff]   ;;  %v863_v5 = vld [vmem:[#allocation6 + $0x18] sm:$0xff]   ;;  %s712_s7 = sshll.u32 %s1040_s21, 7  ;;  %s306_s9 = scalar_lea.vmem [#allocation9], %s689_s25 }
  0x6e   : > { %753 = vmatprep.subr.bf16.mxu1 %v1055_v0  ;;  %769 = vmatprep.mubr.msk.bf16.mxu1 %vm1056_vm0, %v1055_v0  ;;  %v869_v6 = vld [vmem:[#allocation8 + $0x8] sm:$0xff]   ;;  %v864_v7 = vld [vmem:[#allocation6 + $0x20] sm:$0xff]   ;;  %v870_v8 = vld [vmem:[#allocation8 + $0x10] sm:$0xff]   ;;  %s566_s11 = sshll.u32 %s306_s9, 4  ;;  %s1302_s14 = scalar_lea.hbm %s1356_s5, %s712_s7  ;;  %s1304_s11 = int_to_ptr.vmem [resolvable:$true] %s566_s11 }
  0x6f   : > { %734 = vmatpush3.bf16.msra.mxu0 %v860_v1  ;;  %754 = vmatpush3.bf16.msra.mxu1 %v868_v4  ;;  %v865_v9 = vld [vmem:[#allocation6 + $0x28] sm:$0xff]   ;;  %v871_v10 = vld [vmem:[#allocation8 + $0x18] sm:$0xff]   ;;  %v866_v11 = vld [vmem:[#allocation6 + $0x30] sm:$0xff]   ;;  %s553_s21 = scalar_lea.sflag [#allocation5], %s1273_s13  ;;  %s962_s10 = scalar_lea.vmem %s1304_s11, 128 }
  0x70   : > { %735 = vmatprep.subr.bf16.mxu0 %v1055_v0  ;;  %755 = vmatprep.subr.bf16.mxu1 %v1055_v0  ;;  %v872_v12 = vld [vmem:[#allocation8 + $0x20] sm:$0xff]   ;;  %v867_v13 = vld [vmem:[#allocation6 + $0x38] sm:$0xff]   ;;  %v873_v15 = vld [vmem:[#allocation8 + $0x28] sm:$0xff]   ;;  %p963_p8 = scmp.ne.s32.totalorder %s1304_s11, %s962_s10  ;;  %p1371_p12 = scmp.ne.s32.totalorder %s1367_s8, 0 }
  0x71   : > { %v317_v14 = vld [vmem:[%s1279_s17] sm:$0xff]  ;;  %s1057_s25 = smov [#allocation9]  }
  0x72   : > { %v318_v16 = vpack.c.bf16 %v317_v14, %v317_v14  ;;  %v874_v17 = vld [vmem:[#allocation8 + $0x30] sm:$0xff]   ;;  %v875_v18 = vld [vmem:[#allocation8 + $0x38] sm:$0xff]   ;;  %p964_p1 = pnand %p963_p8, %p1371_p12  ;;  %s966_s16 = sshll.u32 %s1057_s25, 4  ;;  %s967_s16 = int_to_ptr.vmem [resolvable:$false] %s966_s16 }
  0x73   : > { %736 = vmatpush3.bf16.msra.mxu0 %v861_v2  ;;  %756 = vmatpush3.bf16.msra.mxu1 %v869_v6  ;;  %v693_v19 = vld [vmem:[%s1353_s2] ss:$0 sm:$0xff]  ;;  %s968_s17 = scalar_lea.vmem %s967_s16, 256  ;;  %p969_p3 = scmp.lt.s32.totalorder %s1304_s11, %s967_s16 }
  0x74   : > { %737 = vmatprep.subr.bf16.mxu0 %v1055_v0  ;;  %757 = vmatprep.subr.bf16.mxu1 %v1055_v0  ;;  %v710_v27 = vld [vmem:[%s1355_s4] ss:$0 sm:$0xff]  ;;  %p965_p10 = pneg %p964_p1  ;;  %p970_p5 = scmp.lt.s32.totalorder %s968_s17, %s962_s10 }
  0x76   : > { %p971_p9 = por %p970_p5, %p969_p3 }
  0x77   : > { %738 = vmatpush3.bf16.msra.mxu0 %v862_v3  ;;  %758 = vmatpush3.bf16.msra.mxu1 %v870_v8 }
  0x78   : > { %739 = vmatprep.subr.bf16.mxu0 %v1055_v0  ;;  %759 = vmatprep.subr.bf16.mxu1 %v1055_v0  ;;  %p972_p11 = pnand %p971_p9, %p965_p10 }
  0x7b   : > { %740 = vmatpush3.bf16.msra.mxu0 %v863_v5  ;;  %760 = vmatpush3.bf16.msra.mxu1 %v871_v10 }
  0x7c   : > { %741 = vmatprep.subr.bf16.mxu0 %v1055_v0  ;;  %761 = vmatprep.subr.bf16.mxu1 %v1055_v0 }
  0x7f   : > { %742 = vmatpush3.bf16.msra.mxu0 %v864_v7  ;;  %762 = vmatpush3.bf16.msra.mxu1 %v872_v12 }
  0x80   : > { %743 = vmatprep.subr.bf16.mxu0 %v1055_v0  ;;  %763 = vmatprep.subr.bf16.mxu1 %v1055_v0 }
  0x83   : > { %744 = vmatpush3.bf16.msra.mxu0 %v865_v9  ;;  %764 = vmatpush3.bf16.msra.mxu1 %v873_v15 }
  0x84   : > { %745 = vmatprep.subr.bf16.mxu0 %v1055_v0  ;;  %765 = vmatprep.subr.bf16.mxu1 %v1055_v0 }
  0x87   : > { %746 = vmatpush3.bf16.msra.mxu0 %v866_v11  ;;  %766 = vmatpush3.bf16.msra.mxu1 %v874_v17 }
  0x88   : > { %747 = vmatprep.subr.bf16.mxu0 %v1055_v0  ;;  %767 = vmatprep.subr.bf16.mxu1 %v1055_v0 }
  0x8b   : > { %748 = vmatpush3.bf16.msra.mxu0 %v867_v13  ;;  %768 = vmatpush3.bf16.msra.mxu1 %v875_v18 }
  0x8e   : > { %750 = vmatmul.mubr.bf16.vlgmr.msra.gmra.mrb[0].mxu0 %v318_v16 }
 0x161   : > { %v424_v20 = vpop.f32.mrb[0].mxu0 }
 0x162   : > { %v425_v21 = vadd.f32 %v693_v19, %v424_v20  ;;  %v751_v22 = vpop.f32.mrb[1].mxu0 }
 0x163   : > { %v427_v23 = vpop.f32.mrb[2].mxu0 }
 0x164   : > { %v430_v24 = vmax.f32 %v425_v21, 0.0  ;;  %v752_v25 = vpop.f32.mrb[3].mxu0 }
 0x166   : > { %v432_v26 = vpack.c.bf16 %v430_v24, %v430_v24 }
 0x168   : > { %770 = vmatmul.mubr.bf16.vlgmr.msra.gmra.mrb[0].mxu1 %v432_v26 }
 0x23b   : > { %v531_v28 = vpop.f32.mrb[0].mxu1 }
 0x23c   : > { %v550_v29 = vadd.f32 %v710_v27, %v531_v28  ;;  %v771_v30 = vpop.f32.mrb[1].mxu1 }
 0x23d   : > { %v534_v31 = vpop.f32.mrb[2].mxu1 }
 0x23e   : > { %551 = vst [vmem:[%s306_s9] sm:$0xff] %v550_v29  ;;  %v772_v32 = vpop.f32.mrb[3].mxu1 }
 0x23f   : > { %975 = shalt.err (!%p972_p11)
}
 0x240   : > { %s976_s13 = scalar_lea.hbm %s1302_s14, 128  ;;  %s980_s30 = scalar_lea.hbm %s1356_s5, 256 }
 0x241   : > { %p977_p0 = scmp.ne.s32.totalorder %s1302_s14, %s976_s13  ;;  %p981_p6 = scmp.lt.u32.totalorder %s1302_s14, %s1356_s5 }
 0x242   : > { %p982_p7 = scmp.lt.u32.totalorder %s980_s30, %s976_s13  ;;  %p984_p8 = scmp.lt.u32.totalorder %s976_s13, %s1302_s14 }
 0x243   : > { %p978_p4 = pnand %p977_p0, %p1371_p12 }
 0x244   : > { %p983_p2 = por %p982_p7, %p981_p6 }
 0x245   : > { %p979_p13 = pneg %p978_p4 }
 0x246   : > { %p985_p1 = por %p984_p8, %p983_p2 }
 0x248   : > { %p986_p10 = pnand %p985_p1, %p979_p13 }
 0x24a   : > { %989 = shalt.err (!%p986_p10)
}
 0x24b   : > { %783 = dma.vmem_to_hbm [thread:$0]  (%p1371_p12), %s1304_s11, 128, %s1302_s14, %s553_s21  }
 0x24c PF: > { %s578_s9 = sand.u32 1, %s1028_s18   ;;  %p1372_p3 = scmp.ne.s32.totalorder %s1364_s29, 0 }
 0x24d   : > { %p1373_p5 = scmp.ge.s32.totalorder %s1048_s23, 2  ;;  %s579_s15 = scalar_lea.sflag [#allocation5], %s578_s9 }
 0x24f   : > { %p797_p9 = pnand %p1373_p5, %p1372_p3 }
 0x251   : > { %1023 = dma.done.wait (!%p797_p9), %s579_s15, 128  }
 0x252   : > { %1025 = vsyncadd (!%p797_p9), %s579_s15, 4294967168  ;;  %s22_s23 = sadd.s32 1, %s1048_s23   ;;  %s1374_s18 = smov %s1032_s19 }
 0x253   : > { %p19_p11 = scmp.ge.s32.totalorder %s22_s23, 4   ;;  %s1375_s19 = smov %s1036_s20 }
 0x254   : > { %s1376_s20 = smov %s1230_s6  ;;  %s1377_s21 = smov %s1044_s22 }
 0x255   : > { %s1378_s22 = smov %s1380_s12  ;;  %21 = sbr.rel (!%p19_p11) target bundleno = 7 (0x7), region = 106 }
 0x25c   :  { %584 = vsyncpa [#allocation4], 1 }
 0x25d   :  { %586 = vsyncpa [#allocation4 + $0x1], 1 }
 0x25e   :  { %587 = vsyncpa [#allocation7], 1 }
 0x25f   :  { %588 = vsyncpa [#allocation5], 1 }
 0x260   :  { %590 = vsyncpa [#allocation5 + $0x1], 1 }

// kernel: tpu_custom_call.1
= control target key start
LH: loop header
LB: loop body
LE: loop exit
PB: predicated region body
PF: predicated region fallthrough
CT: control target
= control target key end

     0   :  { %10 = vsyncpa [#allocation4], 0  ;;  %s1351_s0 = inlined_call_operand.hbm [shape: f32[16,128], index: 0, kind: input, shape index: {}]   ;;  %s1352_s1 = inlined_call_operand.hbm [shape: bf16[128,128], index: 1, kind: input, shape index: {}]   ;;  %s1353_s2 = inlined_call_operand.vmem [shape: f32[1,128], index: 2, kind: input, shape index: {}]   ;;  %s1354_s3 = inlined_call_operand.hbm [shape: bf16[128,128], index: 3, kind: input, shape index: {}]   ;;  %s1355_s4 = inlined_call_operand.vmem [shape: f32[1,128], index: 4, kind: input, shape index: {}]   ;;  %s1356_s5 = inlined_call_operand.hbm [shape: f32[16,128], index: 5, kind: output, shape index: {}]  }
   0x1   :  { %12 = vsyncpa [#allocation4 + $0x1], 0 }
   0x2   :  { %13 = vsyncpa [#allocation7], 0 }
   0x3   :  { %14 = vsyncpa [#allocation5], 0 }
   0x4   :  { %16 = vsyncpa [#allocation5 + $0x1], 0  ;;  %s1088_s18 = smov 0   ;;  %s1090_s19 = smov 0  }
   0x5   :  { %s1092_s20 = smov 0   ;;  %s1094_s21 = smov 0  }
   0x6   :  { %s1096_s22 = smov 0   ;;  %s1098_s23 = smov 0  }
   0x7 LB: > { %s679_s24 = sadd.s32 4294967295, %s1048_s23   ;;  %s680_s25 = sadd.s32 4294967294, %s1048_s23   ;;  %s1048_s23 = sphi %s1098_s23, %s22_s23   ;;  %s1044_s22 = sphi %s1096_s22, %s1378_s22   ;;  %s1040_s21 = sphi %s1094_s21, %s1377_s21   ;;  %s1036_s20 = sphi %s1092_s20, %s1376_s20   ;;  %s1032_s19 = sphi %s1090_s19, %s1375_s19   ;;  %s1028_s18 = sphi %s1088_s18, %s1374_s18  }
   0x8   : > { %p54_p0 = scmp.ne.s32.totalorder %s1032_s19, %s1028_s18  ;;  %p1122_p1 = scmp.eq.s32.totalorder %s679_s24, 0 }
   0x9   : > { %p1126_p2 = scmp.eq.s32.totalorder %s679_s24, 1  ;;  %p183_p3 = scmp.eq.s32.totalorder %s680_s25, 1 }
   0xa   : > { %s1361_s26 = scalar_select %p1122_p1, 1, 0 }
   0xb   : > { %p1132_p4 = por %p1122_p1, %p54_p0  ;;  %p681_p5 = scmp.ge.s32.totalorder %s1048_s23, 1 }
   0xc   : > { %p1137_p6 = por %p183_p3, %p54_p0  ;;  %p190_p7 = scmp.lt.s32.totalorder %s1048_s23, 3 }
   0xd   : > { %s1363_s28 = scalar_select %p1132_p4, 1, 0 }
   0xe   : > { %s1364_s29 = scalar_select %p1137_p6, 1, 0 }
   0xf   : > { %p1142_p8 = pnand %p681_p5, %p190_p7  ;;  %s1050_s6 = smov [#allocation6]  }
  0x10   : > { %s204_s7 = sshll.u32 %s1050_s6, 4  ;;  %s1051_s9 = smov [#allocation8]   ;;  %s1146_s7 = int_to_ptr.vmem [resolvable:$true] %s204_s7 }
  0x11   : > { %p785_p9 = pneg %p1142_p8  ;;  %s226_s10 = sshll.u32 %s1051_s9, 4  ;;  %s1157_s10 = int_to_ptr.vmem [resolvable:$true] %s226_s10 }
  0x12   : > { %s876_s13 = scalar_lea.hbm %s1352_s1, 1024 }
  0x13   : > { %p1153_p11 = pnand %p785_p9, %p1122_p1  ;;  %p877_p12 = scmp.ne.s32.totalorder %s1352_s1, %s876_s13 }
  0x14   : > { %p883_p5 = scmp.lt.u32.totalorder %s876_s13, %s1352_s1 }
  0x15   : > { %p878_p13 = pneg %p1153_p11 }
  0x17   : > { %p879_p0 = pnand %p878_p13, %p877_p12 }
  0x19   : > { %p880_p3 = pneg %p879_p0 }
  0x1b   : > { %p885_p7 = pnand %p883_p5, %p880_p3 }
  0x1d   : > { %888 = shalt.err (!%p885_p7)
}
  0x1e   : > { %s889_s24 = scalar_lea.vmem %s1146_s7, 1024  ;;  %p897_p1 = scmp.lt.s32.totalorder %s1146_s7, %s1146_s7 }
  0x1f   : > { %p890_p9 = scmp.ne.s32.totalorder %s1146_s7, %s889_s24  ;;  %p898_p12 = scmp.lt.s32.totalorder %s889_s24, %s889_s24 }
  0x21   : > { %p892_p10 = pnand %p890_p9, %p878_p13  ;;  %p899_p0 = por %p898_p12, %p897_p1 }
  0x23   : > { %p893_p6 = pneg %p892_p10 }
  0x25   : > { %p900_p4 = pnand %p899_p0, %p893_p6 }
  0x27   : > { %903 = shalt.err (!%p900_p4)
}
  0x28   : > { %s1052_s25 = smov 64   ;;  %s1053_s6 = smov 4  }
  0x29   : > { %788 = dma.hbm_to_vmem [thread:$0]  (!%p1153_p11), %s1352_s1, 1024, %s1146_s7, [#allocation7], %s1052_s25, %s1052_s25, %s1053_s6  }
  0x2a   : > { %s904_s14 = scalar_lea.hbm %s1354_s3, 1024 }
  0x2b   : > { %p905_p1 = scmp.ne.s32.totalorder %s1354_s3, %s904_s14  ;;  %p911_p10 = scmp.lt.u32.totalorder %s904_s14, %s1354_s3 }
  0x2d   : > { %p907_p4 = pnand %p905_p1, %p878_p13 }
  0x2f   : > { %p908_p6 = pneg %p907_p4 }
  0x31   : > { %p913_p3 = pnand %p911_p10, %p908_p6 }
  0x33   : > { %916 = shalt.err (!%p913_p3)
}
  0x34   : > { %s917_s7 = scalar_lea.vmem %s1157_s10, 1024  ;;  %p925_p12 = scmp.lt.s32.totalorder %s1157_s10, %s1157_s10 }
  0x35   : > { %p918_p5 = scmp.ne.s32.totalorder %s1157_s10, %s917_s7  ;;  %p926_p0 = scmp.lt.s32.totalorder %s917_s7, %s917_s7 }
  0x37   : > { %p920_p7 = pnand %p918_p5, %p878_p13  ;;  %p927_p1 = por %p926_p0, %p925_p12 }
  0x39   : > { %p921_p9 = pneg %p920_p7 }
  0x3b   : > { %p928_p4 = pnand %p927_p1, %p921_p9 }
  0x3d   : > { %931 = shalt.err (!%p928_p4)
}
  0x3e   : > { %791 = dma.hbm_to_vmem [thread:$0]  (!%p1153_p11), %s1354_s3, 1024, %s1157_s10, [#allocation7], %s1052_s25, %s1052_s25, %s1053_s6  }
  0x3f   : > { %s34_s12 = sadd.s32 1, %s1044_s22  ;;  %s41_s13 = sadd.s32 1, %s1036_s20 }
  0x40   : > { %p36_p13 = scmp.ge.s32.totalorder %s34_s12, 2  ;;  %p48_p6 = scmp.ne.s32.totalorder %s1036_s20, %s1032_s19 }
  0x41   : > { %p49_p10 = scmp.eq.s32.totalorder %s1048_s23, 0  ;;  %p802_p3 = scmp.lt.s32.totalorder %s1048_s23, 2 }
  0x42   : > { %s1380_s12 = smov (%p36_p13, %s34_s12), 0  ;;  %p1221_p7 = por %p1126_p2, %p48_p6 }
  0x43   : > { %p50_p5 = por %p49_p10, %p48_p6  ;;  %s38_s14 = ssub.s32 %s1044_s22, %s1380_s12 }
  0x44   : > { %s1367_s8 = scalar_select %p1221_p7, 1, 0 }
  0x45   : > { %s243_s15 = sand.u32 1, %s1036_s20   ;;  %p39_p9 = scmp.eq.s32.totalorder %s38_s14, 0 }
  0x46   : > { %s686_s10 = sshll.u32 %s243_s15, 3  ;;  %s687_s25 = sshll.u32 %s1044_s22, 7 }
  0x47   : > { %s1230_s6 = scalar_select %p39_p9, %s1036_s20, %s41_s13  }
  0x48   : > { %s1235_s24 = scalar_lea.hbm %s1351_s0, %s687_s25  ;;  %s247_s27 = scalar_lea.vmem [#allocation3], %s686_s10 }
  0x49   : > { %s254_s7 = sshll.u32 %s247_s27, 4  ;;  %p1239_p2 = pnand %p802_p3, %p50_p5  ;;  %s1243_s7 = int_to_ptr.vmem [resolvable:$true] %s254_s7 }
  0x4a   : > { %s244_s11 = scalar_lea.sflag [#allocation4], %s243_s15  ;;  %s932_s13 = scalar_lea.hbm %s1235_s24, 128 }
  0x4b   : > { %p933_p11 = scmp.ne.s32.totalorder %s1235_s24, %s932_s13  ;;  %p934_p12 = pneg %p1239_p2 }
  0x4c   : > { %s937_s25 = scalar_lea.hbm %s1351_s0, 256  ;;  %p938_p4 = scmp.lt.u32.totalorder %s1235_s24, %s1351_s0 }
  0x4d   : > { %p935_p0 = pnand %p934_p12, %p933_p11  ;;  %p939_p13 = scmp.lt.u32.totalorder %s937_s25, %s932_s13 }
  0x4e   : > { %p941_p10 = scmp.lt.u32.totalorder %s932_s13, %s1235_s24 }
  0x4f   : > { %p936_p1 = pneg %p935_p0  ;;  %p940_p6 = por %p939_p13, %p938_p4 }
  0x51   : > { %p942_p3 = por %p941_p10, %p940_p6 }
  0x53   : > { %p943_p5 = pnand %p942_p3, %p936_p1 }
  0x55   : > { %946 = shalt.err (!%p943_p5)
}
  0x56   : > { %s947_s15 = scalar_lea.vmem %s1243_s7, 128  ;;  %s1054_s27 = smov [#allocation3]  }
  0x57   : > { %p948_p9 = scmp.ne.s32.totalorder %s1243_s7, %s947_s15  ;;  %s952_s14 = sshll.u32 %s1054_s27, 4  ;;  %s953_s14 = int_to_ptr.vmem [resolvable:$false] %s952_s14 }
  0x58   : > { %s954_s10 = scalar_lea.vmem %s953_s14, 256  ;;  %p955_p7 = scmp.lt.s32.totalorder %s1243_s7, %s953_s14 }
  0x59   : > { %p950_p11 = pnand %p948_p9, %p934_p12  ;;  %p956_p4 = scmp.lt.s32.totalorder %s954_s10, %s947_s15 }
  0x5b   : > { %p951_p0 = pneg %p950_p11  ;;  %p957_p13 = por %p956_p4, %p955_p7 }
  0x5d   : > { %p958_p6 = pnand %p957_p13, %p951_p0 }
  0x5f   : > { %961 = shalt.err (!%p958_p6)
}
  0x60   : > { %795 = dma.hbm_to_vmem [thread:$0]  (!%p1239_p2), %s1235_s24, 128, %s1243_s7, %s244_s11  }
  0x61   : > { %263 = sbr.rel (%p1142_p8) target bundleno = 588 (0x24c), region = 40  ;;  %s1273_s13 = sand.u32 (!%p1142_p8), 1, %s1032_s19  }
  0x62   : > { %s689_s25 = sshll.u32 (!%p1142_p8), %s1273_s13, 3  ;;  %s266_s16 = scalar_lea.sflag (!%p1142_p8), [#allocation4], %s1273_s13 }
  0x63   : > { %s1279_s17 = scalar_lea.vmem (!%p1142_p8), [#allocation3], %s689_s25  ;;  %p1369_p7 = scmp.ne.s32.totalorder (!%p1142_p8), %s1363_s28, 0 }
  0x68   : > { %1015 = dma.done.wait (%p1369_p7), %s266_s16, 128  }
  0x69   : > { %1017 = vsyncadd (%p1369_p7), %s266_s16, 4294967168  ;;  %p1370_p2 = scmp.ne.s32.totalorder %s1361_s26, 0 }
  0x6b   : > { %1019 = dma.done.wait (%p1370_p2), [#allocation7], 2048  }
  0x6c   : > { %1021 = vsyncadd (%p1370_p2), [#allocation7], 4294965248  ;;  %v1055_v0 = vmov 0.0   ;;  %vm1056_vm0 = vmmov 0   ;;  %v860_v1 = vld [vmem:[#allocation6] sm:$0xff]   ;;  %v861_v2 = vld [vmem:[#allocation6 + $0x8] sm:$0xff]  }
  0x6d   : > { %733 = vmatprep.subr.bf16.mxu0 %v1055_v0  ;;  %749 = vmatprep.mubr.msk.bf16.mxu0 %vm1056_vm0, %v1055_v0  ;;  %v862_v3 = vld [vmem:[#allocation6 + $0x10] sm:$0xff]   ;;  %v868_v4 = vld [vmem:[#allocation8] sm:$0xff]   ;;  %v863_v5 = vld [vmem:[#allocation6 + $0x18] sm:$0xff]   ;;  %s712_s7 = sshll.u32 %s1040_s21, 7  ;;  %s306_s9 = scalar_lea.vmem [#allocation9], %s689_s25 }
  0x6e   : > { %753 = vmatprep.subr.bf16.mxu1 %v1055_v0  ;;  %769 = vmatprep.mubr.msk.bf16.mxu1 %vm1056_vm0, %v1055_v0  ;;  %v869_v6 = vld [vmem:[#allocation8 + $0x8] sm:$0xff]   ;;  %v864_v7 = vld [vmem:[#allocation6 + $0x20] sm:$0xff]   ;;  %v870_v8 = vld [vmem:[#allocation8 + $0x10] sm:$0xff]   ;;  %s566_s11 = sshll.u32 %s306_s9, 4  ;;  %s1302_s14 = scalar_lea.hbm %s1356_s5, %s712_s7  ;;  %s1304_s11 = int_to_ptr.vmem [resolvable:$true] %s566_s11 }
  0x6f   : > { %734 = vmatpush3.bf16.msra.mxu0 %v860_v1  ;;  %754 = vmatpush3.bf16.msra.mxu1 %v868_v4  ;;  %v865_v9 = vld [vmem:[#allocation6 + $0x28] sm:$0xff]   ;;  %v871_v10 = vld [vmem:[#allocation8 + $0x18] sm:$0xff]   ;;  %v866_v11 = vld [vmem:[#allocation6 + $0x30] sm:$0xff]   ;;  %s553_s21 = scalar_lea.sflag [#allocation5], %s1273_s13  ;;  %s962_s10 = scalar_lea.vmem %s1304_s11, 128 }
  0x70   : > { %735 = vmatprep.subr.bf16.mxu0 %v1055_v0  ;;  %755 = vmatprep.subr.bf16.mxu1 %v1055_v0  ;;  %v872_v12 = vld [vmem:[#allocation8 + $0x20] sm:$0xff]   ;;  %v867_v13 = vld [vmem:[#allocation6 + $0x38] sm:$0xff]   ;;  %v873_v15 = vld [vmem:[#allocation8 + $0x28] sm:$0xff]   ;;  %p963_p8 = scmp.ne.s32.totalorder %s1304_s11, %s962_s10  ;;  %p1371_p12 = scmp.ne.s32.totalorder %s1367_s8, 0 }
  0x71   : > { %v317_v14 = vld [vmem:[%s1279_s17] sm:$0xff]  ;;  %s1057_s25 = smov [#allocation9]  }
  0x72   : > { %v318_v16 = vpack.c.bf16 %v317_v14, %v317_v14  ;;  %v874_v17 = vld [vmem:[#allocation8 + $0x30] sm:$0xff]   ;;  %v875_v18 = vld [vmem:[#allocation8 + $0x38] sm:$0xff]   ;;  %p964_p1 = pnand %p963_p8, %p1371_p12  ;;  %s966_s16 = sshll.u32 %s1057_s25, 4  ;;  %s967_s16 = int_to_ptr.vmem [resolvable:$false] %s966_s16 }
  0x73   : > { %736 = vmatpush3.bf16.msra.mxu0 %v861_v2  ;;  %756 = vmatpush3.bf16.msra.mxu1 %v869_v6  ;;  %v693_v19 = vld [vmem:[%s1353_s2] ss:$0 sm:$0xff]  ;;  %s968_s17 = scalar_lea.vmem %s967_s16, 256  ;;  %p969_p3 = scmp.lt.s32.totalorder %s1304_s11, %s967_s16 }
  0x74   : > { %737 = vmatprep.subr.bf16.mxu0 %v1055_v0  ;;  %757 = vmatprep.subr.bf16.mxu1 %v1055_v0  ;;  %v710_v27 = vld [vmem:[%s1355_s4] ss:$0 sm:$0xff]  ;;  %p965_p10 = pneg %p964_p1  ;;  %p970_p5 = scmp.lt.s32.totalorder %s968_s17, %s962_s10 }
  0x76   : > { %p971_p9 = por %p970_p5, %p969_p3 }
  0x77   : > { %738 = vmatpush3.bf16.msra.mxu0 %v862_v3  ;;  %758 = vmatpush3.bf16.msra.mxu1 %v870_v8 }
  0x78   : > { %739 = vmatprep.subr.bf16.mxu0 %v1055_v0  ;;  %759 = vmatprep.subr.bf16.mxu1 %v1055_v0  ;;  %p972_p11 = pnand %p971_p9, %p965_p10 }
  0x7b   : > { %740 = vmatpush3.bf16.msra.mxu0 %v863_v5  ;;  %760 = vmatpush3.bf16.msra.mxu1 %v871_v10 }
  0x7c   : > { %741 = vmatprep.subr.bf16.mxu0 %v1055_v0  ;;  %761 = vmatprep.subr.bf16.mxu1 %v1055_v0 }
  0x7f   : > { %742 = vmatpush3.bf16.msra.mxu0 %v864_v7  ;;  %762 = vmatpush3.bf16.msra.mxu1 %v872_v12 }
  0x80   : > { %743 = vmatprep.subr.bf16.mxu0 %v1055_v0  ;;  %763 = vmatprep.subr.bf16.mxu1 %v1055_v0 }
  0x83   : > { %744 = vmatpush3.bf16.msra.mxu0 %v865_v9  ;;  %764 = vmatpush3.bf16.msra.mxu1 %v873_v15 }
  0x84   : > { %745 = vmatprep.subr.bf16.mxu0 %v1055_v0  ;;  %765 = vmatprep.subr.bf16.mxu1 %v1055_v0 }
  0x87   : > { %746 = vmatpush3.bf16.msra.mxu0 %v866_v11  ;;  %766 = vmatpush3.bf16.msra.mxu1 %v874_v17 }
  0x88   : > { %747 = vmatprep.subr.bf16.mxu0 %v1055_v0  ;;  %767 = vmatprep.subr.bf16.mxu1 %v1055_v0 }
  0x8b   : > { %748 = vmatpush3.bf16.msra.mxu0 %v867_v13  ;;  %768 = vmatpush3.bf16.msra.mxu1 %v875_v18 }
  0x8e   : > { %750 = vmatmul.mubr.bf16.vlgmr.msra.gmra.mrb[0].mxu0 %v318_v16 }
 0x161   : > { %v424_v20 = vpop.f32.mrb[0].mxu0 }
 0x162   : > { %v425_v21 = vadd.f32 %v693_v19, %v424_v20  ;;  %v751_v22 = vpop.f32.mrb[1].mxu0 }
 0x163   : > { %v427_v23 = vpop.f32.mrb[2].mxu0 }
 0x164   : > { %v430_v24 = vmax.f32 %v425_v21, 0.0  ;;  %v752_v25 = vpop.f32.mrb[3].mxu0 }
 0x166   : > { %v432_v26 = vpack.c.bf16 %v430_v24, %v430_v24 }
 0x168   : > { %770 = vmatmul.mubr.bf16.vlgmr.msra.gmra.mrb[0].mxu1 %v432_v26 }
 0x23b   : > { %v531_v28 = vpop.f32.mrb[0].mxu1 }
 0x23c   : > { %v550_v29 = vadd.f32 %v710_v27, %v531_v28  ;;  %v771_v30 = vpop.f32.mrb[1].mxu1 }
 0x23d   : > { %v534_v31 = vpop.f32.mrb[2].mxu1 }
 0x23e   : > { %551 = vst [vmem:[%s306_s9] sm:$0xff] %v550_v29  ;;  %v772_v32 = vpop.f32.mrb[3].mxu1 }
 0x23f   : > { %975 = shalt.err (!%p972_p11)
}
 0x240   : > { %s976_s13 = scalar_lea.hbm %s1302_s14, 128  ;;  %s980_s30 = scalar_lea.hbm %s1356_s5, 256 }
 0x241   : > { %p977_p0 = scmp.ne.s32.totalorder %s1302_s14, %s976_s13  ;;  %p981_p6 = scmp.lt.u32.totalorder %s1302_s14, %s1356_s5 }
 0x242   : > { %p982_p7 = scmp.lt.u32.totalorder %s980_s30, %s976_s13  ;;  %p984_p8 = scmp.lt.u32.totalorder %s976_s13, %s1302_s14 }
 0x243   : > { %p978_p4 = pnand %p977_p0, %p1371_p12 }
 0x244   : > { %p983_p2 = por %p982_p7, %p981_p6 }
 0x245   : > { %p979_p13 = pneg %p978_p4 }
 0x246   : > { %p985_p1 = por %p984_p8, %p983_p2 }
 0x248   : > { %p986_p10 = pnand %p985_p1, %p979_p13 }
 0x24a   : > { %989 = shalt.err (!%p986_p10)
}
 0x24b   : > { %783 = dma.vmem_to_hbm [thread:$0]  (%p1371_p12), %s1304_s11, 128, %s1302_s14, %s553_s21  }
 0x24c PF: > { %s578_s9 = sand.u32 1, %s1028_s18   ;;  %p1372_p3 = scmp.ne.s32.totalorder %s1364_s29, 0 }
 0x24d   : > { %p1373_p5 = scmp.ge.s32.totalorder %s1048_s23, 2  ;;  %s579_s15 = scalar_lea.sflag [#allocation5], %s578_s9 }
 0x24f   : > { %p797_p9 = pnand %p1373_p5, %p1372_p3 }
 0x251   : > { %1023 = dma.done.wait (!%p797_p9), %s579_s15, 128  }
 0x252   : > { %1025 = vsyncadd (!%p797_p9), %s579_s15, 4294967168  ;;  %s22_s23 = sadd.s32 1, %s1048_s23   ;;  %s1374_s18 = smov %s1032_s19 }
 0x253   : > { %p19_p11 = scmp.ge.s32.totalorder %s22_s23, 4   ;;  %s1375_s19 = smov %s1036_s20 }
 0x254   : > { %s1376_s20 = smov %s1230_s6  ;;  %s1377_s21 = smov %s1044_s22 }
 0x255   : > { %s1378_s22 = smov %s1380_s12  ;;  %21 = sbr.rel (!%p19_p11) target bundleno = 7 (0x7), region = 106 }
 0x25c   :  { %584 = vsyncpa [#allocation4], 1 }
 0x25d   :  { %586 = vsyncpa [#allocation4 + $0x1], 1 }
 0x25e   :  { %587 = vsyncpa [#allocation7], 1 }
 0x25f   :  { %588 = vsyncpa [#allocation5], 1 }
 0x260   :  { %590 = vsyncpa [#allocation5 + $0x1], 1 }

</bundles_post_ra>
